<compile_context>
chip_gen: v6e
topology: v6e:2x2x1
jax: 0.10.0
libtpu: 0.0.40
codegen_flags: <defaults>
</compile_context>

<pallas_src>
import functools

import jax
import jax.numpy as jnp
from jax import lax
from jax.experimental import pallas as pl
from jax.experimental.pallas import tpu as pltpu


def _attn_downsample_kernel(planes_ref, w_ref, b_ref, mask_ref, o_ref,
                            patches_ref, *, bt, cin, rs, m, lf):
    # planes_ref : (1, 4, bt*Cin, lp)  4 = (row parity, col parity) stride-2 planes,
    #                                  flattened spatially with row stride rs;
    #                                  sublane rows ordered (batch, channel)
    # w_ref      : (Cout, 9*Cin)       conv weight, columns ordered (ky, kx, c)
    # b_ref      : (Cout, 1)
    # mask_ref   : (bt*Cin, m)         1.0 on valid flattened columns, 0.0 on pad cols
    # o_ref      : (bt, Cout, m)       flattened conv output (row stride rs)
    # patches_ref: (9*Cin, bt*m)       im2col patch matrix (VMEM scratch)
    rows = bt * cin
    left = rs + 1

    # ---- 3x3 / stride-2 max pool: separable col-max / row-max on parity planes ----
    le = m + rs                                    # even-row window covers dy=0 and dy=2
    p00 = planes_ref[0, 0, :, 0:le + 1]            # even row / even col
    p01 = planes_ref[0, 1, :, 0:le]                # even row / odd col
    p10 = planes_ref[0, 2, :, 0:m + 1]             # odd row  / even col
    p11 = planes_ref[0, 3, :, 0:m]                 # odd row  / odd col
    colmax_e = jnp.maximum(jnp.maximum(p00[:, 0:le], p01), p00[:, 1:le + 1])
    colmax_o = jnp.maximum(jnp.maximum(p10[:, 0:m], p11), p10[:, 1:m + 1])
    pooled = jnp.maximum(jnp.maximum(colmax_e[:, 0:m], colmax_e[:, rs:rs + m]),
                         colmax_o)                                    # (rows, m)
    # zero out conv-padding / garbage columns (-inf never reaches the matmul)
    pooled = jnp.where(mask_ref[...] > 0.5, pooled, 0.0)

    # ---- flattened zero-padded pooled map (row stride rs), kept in vregs ----
    fmap = jnp.concatenate(
        [jnp.zeros((rows, left), jnp.float32),
         pooled,
         jnp.zeros((rows, lf - left - m), jnp.float32)], axis=1)      # (rows, lf)

    # ---- im2col: 9 static lane-shifted slices -> rows of the patch matrix ----
    for ky in range(3):
        for kx in range(3):
            t = 3 * ky + kx
            off = ky * rs + kx
            sl = fmap[:, off:off + m]                                 # (bt*Cin, m)
            for n in range(bt):
                patches_ref[cin * t:cin * (t + 1), n * m:(n + 1) * m] = \
                    sl[n * cin:(n + 1) * cin, :]

    # ---- conv: ONE MXU matmul per grid step + one bias add + lane-dense stores ----
    acc = jnp.dot(w_ref[...], patches_ref[...],
                  preferred_element_type=jnp.float32)                 # (Cout, bt*m)
    acc = acc + b_ref[...]
    for n in range(bt):
        o_ref[n] = acc[:, n * m:(n + 1) * m].astype(o_ref.dtype)


def _pick_block_b(B, cin):
    # prefer >=2 grid steps (megacore on v7x); among those, the largest block so
    # the pooling runs on full sublane tiles and the matmul N is bigger.
    cands = [d for d in range(1, B + 1)
             if B % d == 0 and d <= 16 and d * cin <= 64]
    multi = [d for d in cands if B // d >= 2]
    pool = multi if multi else cands
    return max(pool) if pool else 1


def attention_downsample(x_nchw, w_oihw, bias, *, block_b=None):
    """Equivalent of AttentionDownsample.forward(x) with x in NCHW."""
    B, cin, H, W = x_nchw.shape
    cout = w_oihw.shape[0]
    hp = (H + 2 - 3) // 2 + 1
    wp = (W + 2 - 3) // 2 + 1
    hpp, wpp = hp + 1, wp + 1                      # parity-plane spatial extents

    # Row stride of the flattened maps.  Round it up (when cheap) so the matmul /
    # output lane dim m = hp*rs is a multiple of 128 -> unmasked lane-dense stores.
    rs = wp + 2
    for cand in range(wp + 2, 2 * (wp + 2) + 1):
        if (hp * cand) % 128 == 0:
            rs = cand
            break
    m = hp * rs                                    # per-image matmul N (incl. pad cols)
    lp = (hp + 2) * rs                             # flattened parity-plane length
    lf = (hp + 3) * rs                             # flattened padded pooled-map length

    if block_b is None:
        block_b = _pick_block_b(B, cin)
    assert B % block_b == 0
    nb = B // block_b
    rows = block_b * cin

    x = x_nchw.astype(jnp.float32)
    # -inf halo for the max pool; pad spatial dims up to (2*hpp, 2*wpp)
    x_pad = jnp.pad(x, ((0, 0), (0, 0), (1, 2 * hpp - H - 1), (1, 2 * wpp - W - 1)),
                    constant_values=-jnp.inf)
    # TODO(synk): the stride-2 parity-plane repack stays in XLA as layout glue;
    # in-kernel strided window extraction is not robustly lowerable.
    p4 = x_pad.reshape(nb, block_b, cin, hpp, 2, wpp, 2)
    p4 = jnp.transpose(p4, (0, 4, 6, 1, 2, 3, 5))          # (nb, py, px, n, c, i, j)
    p4 = p4.reshape(nb, 4, rows, hpp, wpp)
    p4 = jnp.pad(p4, ((0, 0),) * 4 + ((0, rs - wpp),))
    planes = p4.reshape(nb, 4, rows, hpp * rs)
    planes = jnp.pad(planes, ((0, 0),) * 3 + ((0, lp - hpp * rs),))   # (nb,4,rows,lp)

    # conv weight (Cout,Cin,3,3) -> (Cout, 9*Cin) with columns ordered (ky, kx, c)
    w2 = jnp.transpose(w_oihw, (0, 2, 3, 1)).reshape(cout, 9 * cin).astype(jnp.float32)
    b2 = bias.reshape(cout, 1).astype(jnp.float32)

    # valid (non conv-padding) columns of the flattened pooled map
    valid = (jnp.arange(m, dtype=jnp.int32) % rs) < wp
    mask = jnp.broadcast_to(valid.astype(jnp.float32)[None, :], (rows, m))

    kernel = functools.partial(_attn_downsample_kernel,
                               bt=block_b, cin=cin, rs=rs, m=m, lf=lf)

    out_flat = pl.pallas_call(
        kernel,
        out_shape=jax.ShapeDtypeStruct((B, cout, m), jnp.float32),
        grid_spec=pltpu.PrefetchScalarGridSpec(
            num_scalar_prefetch=0,
            grid=(nb,),
            in_specs=[
                pl.BlockSpec((1, 4, rows, lp), lambda n: (n, 0, 0, 0)),
                pl.BlockSpec((cout, 9 * cin), lambda n: (0, 0)),
                pl.BlockSpec((cout, 1), lambda n: (0, 0)),
                pl.BlockSpec((rows, m), lambda n: (0, 0)),
            ],
            out_specs=pl.BlockSpec((block_b, cout, m), lambda n: (n, 0, 0)),
            scratch_shapes=[pltpu.VMEM((9 * cin, block_b * m), jnp.float32)],
        ),
        compiler_params=pltpu.CompilerParams(
            dimension_semantics=("parallel",)),
    )(planes, w2, b2, mask)

    # (B, Cout, hp*rs) -> NCHW, dropping the rs-wp padded columns per row
    return out_flat.reshape(B, cout, hp, rs)[:, :, :, :wp]


if __name__ == "__main__":
    key = jax.random.PRNGKey(0)
    kx, kw, kb = jax.random.split(key, 3)

    B, Cin, H, W, Cout = 2, 4, 16, 16, 32
    x = jax.random.normal(kx, (B, Cin, H, W), dtype=jnp.float32)
    w = 0.1 * jax.random.normal(kw, (Cout, Cin, 3, 3), dtype=jnp.float32)
    b = 0.1 * jax.random.normal(kb, (Cout,), dtype=jnp.float32)

    out = attention_downsample(x, w, b)
    out = jax.block_until_ready(out)

    # Pure-JAX reference: max_pool2d(k=3, s=2, p=1) then conv2d(k=3, s=1, p=1).
    pooled_ref = lax.reduce_window(x, -jnp.inf, lax.max,
                                   (1, 1, 3, 3), (1, 1, 2, 2),
                                   ((0, 0), (0, 0), (1, 1), (1, 1)))
    ref = lax.conv_general_dilated(pooled_ref, w, (1, 1), ((1, 1), (1, 1)),
                                   dimension_numbers=("NCHW", "OIHW", "NCHW"))
    ref = ref + b.reshape(1, Cout, 1, 1)

    hp = (H + 2 - 3) // 2 + 1
    wp = (W + 2 - 3) // 2 + 1
    assert out.shape == (B, Cout, hp, wp), out.shape
    assert jnp.allclose(out, ref, atol=1e-4, rtol=1e-4), \
        float(jnp.max(jnp.abs(out - ref)))
    print("KERNEL_OK")
</pallas_src>

<mosaic_0001>
module attributes {stable_mosaic.version = 11 : i64} {
  func.func @_attn_downsample_kernel(%arg0: i32, %arg1: memref<1x4x4x160xf32, #tpu.memory_space<vmem>>, %arg2: memref<32x36xf32, #tpu.memory_space<vmem>>, %arg3: memref<32x1xf32, #tpu.memory_space<vmem>>, %arg4: memref<4x128xf32, #tpu.memory_space<vmem>>, %arg5: memref<1x32x128xf32, #tpu.memory_space<vmem>>, %arg6: memref<36x128xf32, #tpu.memory_space<vmem>>) attributes {dimension_semantics = [#tpu.dimension_semantics<parallel>], iteration_bounds = array<i64: 2>, scalar_prefetch = 0 : i64, scratch_operands = 1 : i64, tpu.core_type = #tpu.core_type<tc>, window_params = [{transform_indices = @transform_0, window_bounds = array<i64: 1, 4, 4, 160>}, {pipeline_mode = #tpu.pipeline_mode<synchronous>, transform_indices = @transform_1, window_bounds = array<i64: 32, 36>}, {pipeline_mode = #tpu.pipeline_mode<synchronous>, transform_indices = @transform_2, window_bounds = array<i64: 32, 1>}, {pipeline_mode = #tpu.pipeline_mode<synchronous>, transform_indices = @transform_3, window_bounds = array<i64: 4, 128>}, {transform_indices = @transform_4, window_bounds = array<i64: 1, 32, 128>}]} {
    %c0 = arith.constant 0 : index
    %c0_0 = arith.constant 0 : index
    %c0_1 = arith.constant 0 : index
    %c0_2 = arith.constant 0 : index
    %0 = vector.load %arg1[%c0, %c0_0, %c0_1, %c0_2] : memref<1x4x4x160xf32, #tpu.memory_space<vmem>>, vector<1x1x4x145xf32>
    %1 = vector.shape_cast %0 : vector<1x1x4x145xf32> to vector<4x145xf32>
    %c0_3 = arith.constant 0 : index
    %c1 = arith.constant 1 : index
    %c0_4 = arith.constant 0 : index
    %c0_5 = arith.constant 0 : index
    %2 = vector.load %arg1[%c0_3, %c1, %c0_4, %c0_5] : memref<1x4x4x160xf32, #tpu.memory_space<vmem>>, vector<1x1x4x144xf32>
    %3 = vector.shape_cast %2 : vector<1x1x4x144xf32> to vector<4x144xf32>
    %c0_6 = arith.constant 0 : index
    %c2 = arith.constant 2 : index
    %c0_7 = arith.constant 0 : index
    %c0_8 = arith.constant 0 : index
    %4 = vector.load %arg1[%c0_6, %c2, %c0_7, %c0_8] : memref<1x4x4x160xf32, #tpu.memory_space<vmem>>, vector<1x1x4x129xf32>
    %5 = vector.shape_cast %4 : vector<1x1x4x129xf32> to vector<4x129xf32>
    %c0_9 = arith.constant 0 : index
    %c3 = arith.constant 3 : index
    %c0_10 = arith.constant 0 : index
    %c0_11 = arith.constant 0 : index
    %6 = vector.load %arg1[%c0_9, %c3, %c0_10, %c0_11] : memref<1x4x4x160xf32, #tpu.memory_space<vmem>>, vector<1x1x4x128xf32>
    %7 = vector.shape_cast %6 : vector<1x1x4x128xf32> to vector<4x128xf32>
    %8 = vector.extract_strided_slice %1 {offsets = [0, 0], sizes = [4, 144], strides = [1, 1]} : vector<4x145xf32> to vector<4x144xf32>
    %9 = arith.maximumf %8, %3 : vector<4x144xf32>
    %10 = vector.extract_strided_slice %1 {offsets = [0, 1], sizes = [4, 144], strides = [1, 1]} : vector<4x145xf32> to vector<4x144xf32>
    %11 = arith.maximumf %9, %10 : vector<4x144xf32>
    %12 = vector.extract_strided_slice %5 {offsets = [0, 0], sizes = [4, 128], strides = [1, 1]} : vector<4x129xf32> to vector<4x128xf32>
    %13 = arith.maximumf %12, %7 : vector<4x128xf32>
    %14 = vector.extract_strided_slice %5 {offsets = [0, 1], sizes = [4, 128], strides = [1, 1]} : vector<4x129xf32> to vector<4x128xf32>
    %15 = arith.maximumf %13, %14 : vector<4x128xf32>
    %16 = vector.extract_strided_slice %11 {offsets = [0, 0], sizes = [4, 128], strides = [1, 1]} : vector<4x144xf32> to vector<4x128xf32>
    %17 = vector.extract_strided_slice %11 {offsets = [0, 16], sizes = [4, 128], strides = [1, 1]} : vector<4x144xf32> to vector<4x128xf32>
    %18 = arith.maximumf %16, %17 : vector<4x128xf32>
    %19 = arith.maximumf %18, %15 : vector<4x128xf32>
    %c0_12 = arith.constant 0 : index
    %c0_13 = arith.constant 0 : index
    %20 = vector.load %arg4[%c0_12, %c0_13] : memref<4x128xf32, #tpu.memory_space<vmem>>, vector<4x128xf32>
    %cst = arith.constant 5.000000e-01 : f32
    %21 = vector.broadcast %cst : f32 to vector<4x128xf32>
    %22 = arith.cmpf ogt, %20, %21 : vector<4x128xf32>
    %cst_14 = arith.constant 0.000000e+00 : f32
    %23 = vector.broadcast %cst_14 : f32 to vector<4x128xf32>
    %24 = arith.select %22, %19, %23 : vector<4x128xi1>, vector<4x128xf32>
    %cst_15 = arith.constant 0.000000e+00 : f32
    %25 = vector.broadcast %cst_15 : f32 to vector<4x17xf32>
    %cst_16 = arith.constant 0.000000e+00 : f32
    %26 = vector.broadcast %cst_16 : f32 to vector<4x31xf32>
    %27 = tpu.concatenate %25, %24, %26 in 1 : vector<4x17xf32>, vector<4x128xf32>, vector<4x31xf32> -> vector<4x176xf32>
    %28 = vector.extract_strided_slice %27 {offsets = [0, 0], sizes = [4, 128], strides = [1, 1]} : vector<4x176xf32> to vector<4x128xf32>
    %c0_17 = arith.constant 0 : index
    %c0_18 = arith.constant 0 : index
    %29 = vector.load %arg6[%c0_17, %c0_18] : memref<36x128xf32, #tpu.memory_space<vmem>>, vector<4x128xf32>
    tpu.vector_store %arg6[%c0_17, %c0_18], %28 {strides = array<i32>} : memref<36x128xf32, #tpu.memory_space<vmem>>, vector<4x128xf32>,
    %30 = vector.extract_strided_slice %27 {offsets = [0, 1], sizes = [4, 128], strides = [1, 1]} : vector<4x176xf32> to vector<4x128xf32>
    %c4 = arith.constant 4 : index
    %c0_19 = arith.constant 0 : index
    %31 = vector.load %arg6[%c4, %c0_19] : memref<36x128xf32, #tpu.memory_space<vmem>>, vector<4x128xf32>
    tpu.vector_store %arg6[%c4, %c0_19], %30 {strides = array<i32>} : memref<36x128xf32, #tpu.memory_space<vmem>>, vector<4x128xf32>,
    %32 = vector.extract_strided_slice %27 {offsets = [0, 2], sizes = [4, 128], strides = [1, 1]} : vector<4x176xf32> to vector<4x128xf32>
    %c8 = arith.constant 8 : index
    %c0_20 = arith.constant 0 : index
    %33 = vector.load %arg6[%c8, %c0_20] : memref<36x128xf32, #tpu.memory_space<vmem>>, vector<4x128xf32>
    tpu.vector_store %arg6[%c8, %c0_20], %32 {strides = array<i32>} : memref<36x128xf32, #tpu.memory_space<vmem>>, vector<4x128xf32>,
    %34 = vector.extract_strided_slice %27 {offsets = [0, 16], sizes = [4, 128], strides = [1, 1]} : vector<4x176xf32> to vector<4x128xf32>
    %c12 = arith.constant 12 : index
    %c0_21 = arith.constant 0 : index
    %35 = vector.load %arg6[%c12, %c0_21] : memref<36x128xf32, #tpu.memory_space<vmem>>, vector<4x128xf32>
    tpu.vector_store %arg6[%c12, %c0_21], %34 {strides = array<i32>} : memref<36x128xf32, #tpu.memory_space<vmem>>, vector<4x128xf32>,
    %36 = vector.extract_strided_slice %27 {offsets = [0, 17], sizes = [4, 128], strides = [1, 1]} : vector<4x176xf32> to vector<4x128xf32>
    %c16 = arith.constant 16 : index
    %c0_22 = arith.constant 0 : index
    %37 = vector.load %arg6[%c16, %c0_22] : memref<36x128xf32, #tpu.memory_space<vmem>>, vector<4x128xf32>
    tpu.vector_store %arg6[%c16, %c0_22], %36 {strides = array<i32>} : memref<36x128xf32, #tpu.memory_space<vmem>>, vector<4x128xf32>,
    %38 = vector.extract_strided_slice %27 {offsets = [0, 18], sizes = [4, 128], strides = [1, 1]} : vector<4x176xf32> to vector<4x128xf32>
    %c20 = arith.constant 20 : index
    %c0_23 = arith.constant 0 : index
    %39 = vector.load %arg6[%c20, %c0_23] : memref<36x128xf32, #tpu.memory_space<vmem>>, vector<4x128xf32>
    tpu.vector_store %arg6[%c20, %c0_23], %38 {strides = array<i32>} : memref<36x128xf32, #tpu.memory_space<vmem>>, vector<4x128xf32>,
    %40 = vector.extract_strided_slice %27 {offsets = [0, 32], sizes = [4, 128], strides = [1, 1]} : vector<4x176xf32> to vector<4x128xf32>
    %c24 = arith.constant 24 : index
    %c0_24 = arith.constant 0 : index
    %41 = vector.load %arg6[%c24, %c0_24] : memref<36x128xf32, #tpu.memory_space<vmem>>, vector<4x128xf32>
    tpu.vector_store %arg6[%c24, %c0_24], %40 {strides = array<i32>} : memref<36x128xf32, #tpu.memory_space<vmem>>, vector<4x128xf32>,
    %42 = vector.extract_strided_slice %27 {offsets = [0, 33], sizes = [4, 128], strides = [1, 1]} : vector<4x176xf32> to vector<4x128xf32>
    %c28 = arith.constant 28 : index
    %c0_25 = arith.constant 0 : index
    %43 = vector.load %arg6[%c28, %c0_25] : memref<36x128xf32, #tpu.memory_space<vmem>>, vector<4x128xf32>
    tpu.vector_store %arg6[%c28, %c0_25], %42 {strides = array<i32>} : memref<36x128xf32, #tpu.memory_space<vmem>>, vector<4x128xf32>,
    %44 = vector.extract_strided_slice %27 {offsets = [0, 34], sizes = [4, 128], strides = [1, 1]} : vector<4x176xf32> to vector<4x128xf32>
    %c32 = arith.constant 32 : index
    %c0_26 = arith.constant 0 : index
    %45 = vector.load %arg6[%c32, %c0_26] : memref<36x128xf32, #tpu.memory_space<vmem>>, vector<4x128xf32>
    tpu.vector_store %arg6[%c32, %c0_26], %44 {strides = array<i32>} : memref<36x128xf32, #tpu.memory_space<vmem>>, vector<4x128xf32>,
    %c0_27 = arith.constant 0 : index
    %c0_28 = arith.constant 0 : index
    %46 = vector.load %arg2[%c0_27, %c0_28] : memref<32x36xf32, #tpu.memory_space<vmem>>, vector<32x36xf32>
    %c0_29 = arith.constant 0 : index
    %c0_30 = arith.constant 0 : index
    %47 = vector.load %arg6[%c0_29, %c0_30] : memref<36x128xf32, #tpu.memory_space<vmem>>, vector<36x128xf32>
    %cst_31 = arith.constant dense<0.000000e+00> : vector<32x128xf32>
    %48 = tpu.matmul %46, %47, %cst_31 {dimension_numbers = #tpu.dot_dimension_numbers<[1], [0], [0], [1], [0, 0, 1, 1], [], []>} : vector<32x36xf32>, vector<36x128xf32>, vector<32x128xf32> -> vector<32x128xf32>
    %c0_32 = arith.constant 0 : index
    %c0_33 = arith.constant 0 : index
    %49 = vector.load %arg3[%c0_32, %c0_33] : memref<32x1xf32, #tpu.memory_space<vmem>>, vector<32x1xf32>
    %50 = vector.broadcast %49 : vector<32x1xf32> to vector<32x128xf32>
    %51 = arith.addf %48, %50 : vector<32x128xf32>
    %c0_34 = arith.constant 0 : index
    %c0_35 = arith.constant 0 : index
    %c0_36 = arith.constant 0 : index
    %52 = vector.load %arg5[%c0_34, %c0_35, %c0_36] : memref<1x32x128xf32, #tpu.memory_space<vmem>>, vector<1x32x128xf32>
    %53 = vector.shape_cast %52 : vector<1x32x128xf32> to vector<32x128xf32>
    %54 = vector.shape_cast %51 : vector<32x128xf32> to vector<1x32x128xf32>
    tpu.vector_store %arg5[%c0_34, %c0_35, %c0_36], %54 {strides = array<i32>} : memref<1x32x128xf32, #tpu.memory_space<vmem>>, vector<1x32x128xf32>,
    return
  }
  func.func @transform_0(%arg0: i32) -> (i32, i32, i32, i32) {
    %c0_i32 = arith.constant 0 : i32
    %c0_i32_0 = arith.constant 0 : i32
    %c0_i32_1 = arith.constant 0 : i32
    %c0_i32_2 = arith.constant 0 : i32
    return %arg0, %c0_i32, %c0_i32_0, %c0_i32_1 : i32, i32, i32, i32
  }
  func.func @transform_1(%arg0: i32) -> (i32, i32) {
    %c0_i32 = arith.constant 0 : i32
    %c0_i32_0 = arith.constant 0 : i32
    %c0_i32_1 = arith.constant 0 : i32
    return %c0_i32, %c0_i32_0 : i32, i32
  }
  func.func @transform_2(%arg0: i32) -> (i32, i32) {
    %c0_i32 = arith.constant 0 : i32
    %c0_i32_0 = arith.constant 0 : i32
    %c0_i32_1 = arith.constant 0 : i32
    return %c0_i32, %c0_i32_0 : i32, i32
  }
  func.func @transform_3(%arg0: i32) -> (i32, i32) {
    %c0_i32 = arith.constant 0 : i32
    %c0_i32_0 = arith.constant 0 : i32
    %c0_i32_1 = arith.constant 0 : i32
    return %c0_i32, %c0_i32_0 : i32, i32
  }
  func.func @transform_4(%arg0: i32) -> (i32, i32, i32) {
    %c0_i32 = arith.constant 0 : i32
    %c0_i32_0 = arith.constant 0 : i32
    %c0_i32_1 = arith.constant 0 : i32
    return %arg0, %c0_i32, %c0_i32_0 : i32, i32, i32
  }
}

</mosaic_0001>

<bundles_post_ra>
// kernel: tpu_custom_call.1
= control target key start
LH: loop header
LB: loop body
LE: loop exit
PB: predicated region body
PF: predicated region fallthrough
CT: control target
= control target key end

     0   :  { %9 = vsyncpa [#allocation4], 0  ;;  %s1007_s0 = inlined_call_operand.hbm [shape: f32[2,4,4,160], index: 0, kind: input, shape index: {}]   ;;  %s1008_s1 = inlined_call_operand.vmem [shape: f32[32,36], index: 1, kind: input, shape index: {}]   ;;  %s1009_s2 = inlined_call_operand.vmem [shape: f32[32,1], index: 2, kind: input, shape index: {}]   ;;  %s1010_s3 = inlined_call_operand.vmem [shape: f32[4,128], index: 3, kind: input, shape index: {}]   ;;  %s1011_s4 = inlined_call_operand.hbm [shape: f32[2,32,128], index: 4, kind: output, shape index: {}]  }
   0x1   :  { %11 = vsyncpa [#allocation4 + $0x1], 0 }
   0x2   :  { %12 = vsyncpa [#allocation5], 0 }
   0x3   :  { %14 = vsyncpa [#allocation5 + $0x1], 0  ;;  %s806_s15 = smov 0   ;;  %s808_s16 = smov 0  }
   0x4   :  { %s810_s17 = smov 0   ;;  %s812_s18 = smov 0  }
   0x5 LB: > { %s827_s19 = sadd.s32 4294967295, %s763_s18   ;;  %s550_s20 = sadd.s32 4294967294, %s763_s18   ;;  %s763_s18 = sphi %s812_s18, %s1026_s18   ;;  %s759_s17 = sphi %s810_s17, %s1025_s17   ;;  %s755_s16 = sphi %s808_s16, %s1024_s16   ;;  %s751_s15 = sphi %s806_s15, %s1023_s15  }
   0x6   : > { %s831_s21 = sadd.s32 1, %s763_s18   ;;  %s27_s22 = sadd.s32 1, %s759_s17 }
   0x7   : > { %s24_s23 = ssub.s32 %s763_s18, %s831_s21  ;;  %p34_p0 = scmp.ne.s32.totalorder %s759_s17, %s755_s16 }
   0x8   : > { %p25_p1 = scmp.eq.s32.totalorder %s24_s23, 0  ;;  %p35_p2 = scmp.eq.s32.totalorder %s763_s18, 0 }
   0x9   : > { %p40_p3 = scmp.ne.s32.totalorder %s755_s16, %s751_s15  ;;  %p41_p4 = scmp.eq.s32.totalorder %s827_s19, 0 }
   0xa   : > { %s843_s24 = scalar_select %p25_p1, %s759_s17, %s27_s22  }
   0xb   : > { %p845_p5 = por %p35_p2, %p34_p0  ;;  %p849_p6 = por %p41_p4, %p40_p3 }
   0xc   : > { %p127_p7 = scmp.eq.s32.totalorder %s827_s19, 1  ;;  %p133_p8 = scmp.eq.s32.totalorder %s550_s20, 1 }
   0xd   : > { %s1015_s26 = scalar_select %p849_p6, 1, 0 }
   0xe   : > { %p621_p10 = scmp.lt.s32.totalorder %s763_s18, 2  ;;  %p856_p11 = por %p127_p7, %p34_p0 }
   0xf   : > { %p860_p12 = por %p133_p8, %p40_p3  ;;  %s162_s29 = sand.u32 1, %s759_s17  }
  0x10   : > { %s1016_s27 = scalar_select %p856_p11, 1, 0 }
  0x11   : > { %s1017_s28 = scalar_select %p860_p12, 1, 0 }
  0x12   : > { %s572_s30 = sshll.u32 %s763_s18, 9  ;;  %s553_s5 = sshll.u32 %s162_s29, 5 }
  0x13   : > { %s869_s8 = scalar_lea.hbm %s1007_s0, %s572_s30  ;;  %s166_s9 = scalar_lea.vmem [#allocation3], %s553_s5 }
  0x14   : > { %s173_s10 = sshll.u32 %s166_s9, 4  ;;  %p873_p13 = pnand %p621_p10, %p845_p5  ;;  %s877_s10 = int_to_ptr.vmem [resolvable:$true] %s173_s10 }
  0x15   : > { %s879_s12 = scalar_lea.sflag [#allocation4], %s162_s29  ;;  %s671_s13 = scalar_lea.hbm %s869_s8, 512 }
  0x16   : > { %p672_p0 = scmp.ne.s32.totalorder %s869_s8, %s671_s13  ;;  %p673_p1 = pneg %p873_p13 }
  0x17   : > { %s676_s22 = scalar_lea.hbm %s1007_s0, 1024  ;;  %p677_p4 = scmp.lt.s32.totalorder %s869_s8, %s1007_s0 }
  0x18   : > { %p674_p2 = pnand %p673_p1, %p672_p0  ;;  %p678_p5 = scmp.lt.s32.totalorder %s676_s22, %s671_s13 }
  0x1a   : > { %p675_p3 = pneg %p674_p2  ;;  %p679_p7 = por %p678_p5, %p677_p4 }
  0x1c   : > { %p680_p8 = pnand %p679_p7, %p675_p3 }
  0x1e   : > { %683 = shalt.err (!%p680_p8)
}
  0x1f   : > { %s684_s29 = scalar_lea.vmem %s877_s10, 512  ;;  %s765_s30 = smov [#allocation3]  }
  0x20   : > { %p685_p10 = scmp.ne.s32.totalorder %s877_s10, %s684_s29  ;;  %s689_s5 = sshll.u32 %s765_s30, 4  ;;  %s690_s5 = int_to_ptr.vmem [resolvable:$false] %s689_s5 }
  0x21   : > { %s691_s6 = scalar_lea.vmem %s690_s5, 1024  ;;  %p692_p2 = scmp.lt.s32.totalorder %s877_s10, %s690_s5 }
  0x22   : > { %p687_p9 = pnand %p685_p10, %p673_p1  ;;  %p693_p12 = scmp.lt.s32.totalorder %s691_s6, %s684_s29 }
  0x24   : > { %p688_p0 = pneg %p687_p9  ;;  %p694_p11 = por %p693_p12, %p692_p2 }
  0x26   : > { %p695_p6 = pnand %p694_p11, %p688_p0 }
  0x28   : > { %698 = shalt.err (!%p695_p6)
}
  0x29   : > { %s766_s7 = smov 128   ;;  %s767_s9 = smov 8  }
  0x2a   : > { %616 = dma.hbm_to_vmem [thread:$0]  (!%p873_p13), %s869_s8, 512, %s877_s10, %s879_s12, %s766_s7, %s766_s7, %s767_s9  }
  0x2b   : > { %p556_p9 = scmp.ge.s32.totalorder %s763_s18, 1  ;;  %p181_p1 = scmp.lt.s32.totalorder %s763_s18, 3 }
  0x2d   : > { %p182_p3 = pnand %p556_p9, %p181_p1 }
  0x2e   : > { %s903_s13 = sand.u32 (!%p182_p3), 1, %s755_s16   ;;  %p1019_p6 = scmp.ne.s32.totalorder (!%p182_p3), %s1015_s26, 0 }
  0x2f   : > { %185 = sbr.rel (%p182_p3) target bundleno = 778 (0x30a), region = 36  ;;  %s557_s14 = sshll.u32 (!%p182_p3), %s903_s13, 5 }
  0x30   : > { %s188_s20 = scalar_lea.sflag (!%p182_p3), [#allocation4], %s903_s13  ;;  %s191_s22 = scalar_lea.vmem (!%p182_p3), [#allocation3], %s557_s14 }
  0x34   : > { %742 = dma.done.wait (%p1019_p6), %s188_s20, 512  }
  0x35   : > { %744 = vsyncadd (%p1019_p6), %s188_s20, 4294966784  ;;  %v216_v0 = vld [vmem:[%s191_s22] sm:$0xff]  ;;  %s768_s8 = smov 127   ;;  %v560_v1 = vld [vmem:[%s191_s22 + $0x10] sm:$0xff]  ;;  %vm228_vm0 = vcmask 1039360   ;;  %s769_s10 = smov 112  }
  0x36   : > { %225 = vrot.lane.b32.xlu0 %v216_v0, %s768_s8  ;;  %v559_v2 = vld [vmem:[%s191_s22 + $0x8] sm:$0xff]  ;;  %v561_v9 = vld [vmem:[%s191_s22 + $0x18] sm:$0xf]  ;;  %vm244_vm1 = vcmask 916480   ;;  %s770_s12 = smov 17   ;;  %vm256_vm3 = vcmask 138240  }
  0x37   : > { %v223_v3 = vmax.f32 %v216_v0, %v559_v2  ;;  %v232_v11 = vmax.f32 %v560_v1, %v561_v9  ;;  %v249_v15 = vld [vmem:[%s1010_s3] sm:$0xf]  ;;  %s771_s23 = smov 94   ;;  %s772_s25 = smov 96   ;;  %vm357_vm4 = vcmask 293888   ;;  %v326_v25 = vld [vmem:[%s1008_s1 + $0x10] sm:$0xff] }
  0x38   : > { %vm250_vm2 = vcmp.gt.f32.partialorder %v249_v15, 0.5  ;;  %s773_s29 = smov 95   ;;  %s774_s30 = smov 111   ;;  %v324_v24 = vld [vmem:[%s1008_s1] sm:$0xff]  ;;  %596 = vmatprep.mubr.msk.f32.mxu1 %vm357_vm4, %v326_v25  ;;  %v777_v26 = vmov 0   ;;  %v334_v27 = vld [vmem:[%s1009_s2 + $0x8] sm:$0xff] }
  0x39   : > { %s775_s5 = smov 110   ;;  %s776_s6 = smov 126   ;;  %593 = vmatprep.mubr.msk.f32.mxu0 %vm357_vm4, %v324_v24  ;;  %670 = vset.pattern.permute.xlu1 %v777_v26  ;;  %v333_v28 = vld [vmem:[%s1009_s2] sm:$0xff]  ;;  %v335_v29 = vld [vmem:[%s1009_s2 + $0x10] sm:$0xff]  ;;  %v336_v30 = vld [vmem:[%s1009_s2 + $0x18] sm:$0xff]  ;;  %vm320_vm5 = vcmask 769024  }
  0x3a   : > { %234 = vrot.lane.b32.xlu0 %v560_v1, %s768_s8  ;;  %vm304_vm6 = vcmask 785408   ;;  %vm312_vm7 = vcmask 777216   ;;  %vm370_vm8 = vcmask 1043456   ;;  %vm288_vm9 = vcmask 908288   ;;  %v325_v60 = vld [vmem:[%s1008_s1 + $0x8] sm:$0xff]  ;;  %v327_v61 = vld [vmem:[%s1008_s1 + $0x18] sm:$0xff] }
  0x3b   : > { %669 = vset.pattern.permute.xlu0 %v777_v26  ;;  %vm296_vm10 = vcmask 900096   ;;  %vm273_vm11 = vcmask 1031168   ;;  %s215_s9 = scalar_lea.vmem [#allocation6], %s557_s14  ;;  %s573_s22 = sshll.u32 %s827_s19, 9 }
  0x3c   : > { %s477_s20 = sshll.u32 %s215_s9, 4  ;;  %s964_s14 = scalar_lea.hbm %s1011_s4, %s573_s22  ;;  %s959_s20 = int_to_ptr.vmem [resolvable:$true] %s477_s20 }
  0x3d   : > { %s464_s19 = scalar_lea.sflag [#allocation5], %s903_s13  ;;  %s699_s11 = scalar_lea.vmem %s959_s20, 512 }
  0x3e   : > { %p700_p11 = scmp.ne.s32.totalorder %s959_s20, %s699_s11  ;;  %p1020_p12 = scmp.ne.s32.totalorder %s1016_s27, 0 }
  0x40   : > { %p701_p13 = pnand %p700_p11, %p1020_p12 }
  0x42   : > { %p702_p4 = pneg %p701_p13 }
  0xa8   : > { %v226_v4 = vpop.permute.xlu0 %225 }
  0xa9   : > { %v227_v5 = vrot.slane %v226_v4, 4 }
  0xab   : > { %v229_v6 = vsel %vm228_vm0, %v226_v4, %v227_v5 }
  0xac   : > { %v231_v7 = vmax.f32 %v223_v3, %v229_v6  ;;  %v235_v8 = vpop.permute.xlu0 %234 }
  0xad   : > { %v236_v10 = vrot.slane %v235_v8, 4 }
  0xae   : > { %241 = vrot.lane.b32.xlu1 %v231_v7, %s769_s10 }
  0xaf   : > { %v237_v13 = vsel %vm228_vm0, %v235_v8, %v236_v10 }
  0xb0   : > { %v239_v17 = vmax.f32 %v232_v11, %v237_v13 }
 0x120   : > { %v242_v12 = vpop.permute.xlu1 %241 }
 0x121   : > { %v243_v14 = vrot.slane %v242_v12, 4 }
 0x123   : > { %v245_v16 = vsel %vm244_vm1, %v242_v12, %v243_v14 }
 0x124   : > { %v247_v18 = vmax.f32 %v231_v7, %v245_v16 }
 0x126   : > { %v248_v19 = vmax.f32 %v247_v18, %v239_v17 }
 0x128   : > { %v251_v20 = vsel %vm250_vm2, %v248_v19, 0.0 }
 0x129   : > { %253 = vrot.lane.b32.xlu1 %v251_v20, %s770_s12  ;;  %s778_s12 = smov [#allocation6]  }
 0x19b   : > { %v254_v21 = vpop.permute.xlu1 %253 }
 0x19c   : > { %v257_v22 = vsel %vm256_vm3, 0.0, %v254_v21  ;;  %v258_v23 = vsel %vm256_vm3, %v254_v21, 0.0 }
 0x19d   : > { %259 = vst [vmem:[#allocation2] sm:$0xf] %v257_v22  ;;  %318 = vrot.lane.b32.xlu1 %v258_v23, %s771_s23  ;;  %316 = vrot.lane.b32.xlu0 %v257_v22, %s771_s23  ;;  %s703_s23 = sshll.u32 %s778_s12, 4  ;;  %s704_s23 = int_to_ptr.vmem [resolvable:$false] %s703_s23 }
 0x19e   : > { %p706_p5 = scmp.lt.s32.totalorder %s959_s20, %s704_s23 }
 0x1a1   : > { %302 = vrot.lane.b32.xlu1 %v258_v23, %s772_s25  ;;  %300 = vrot.lane.b32.xlu0 %v257_v22, %s772_s25  ;;  %s705_s25 = scalar_lea.vmem %s704_s23, 1024 }
 0x1a2   : > { %p707_p7 = scmp.lt.s32.totalorder %s705_s25, %s699_s11 }
 0x1a4   : > { %p708_p8 = por %p707_p7, %p706_p5 }
 0x1a5   : > { %310 = vrot.lane.b32.xlu1 %v258_v23, %s773_s29  ;;  %308 = vrot.lane.b32.xlu0 %v257_v22, %s773_s29 }
 0x1a6   : > { %p709_p10 = pnand %p708_p8, %p702_p4 }
 0x1a9   : > { %286 = vrot.lane.b32.xlu1 %v258_v23, %s774_s30  ;;  %284 = vrot.lane.b32.xlu0 %v257_v22, %s774_s30 }
 0x1ad   : > { %294 = vrot.lane.b32.xlu1 %v258_v23, %s775_s5  ;;  %292 = vrot.lane.b32.xlu0 %v257_v22, %s775_s5 }
 0x1b1   : > { %271 = vrot.lane.b32.xlu1 %v258_v23, %s776_s6  ;;  %269 = vrot.lane.b32.xlu0 %v257_v22, %s776_s6 }
 0x1b5   : > { %279 = vrot.lane.b32.xlu1 %v258_v23, %s769_s10  ;;  %277 = vrot.lane.b32.xlu0 %v257_v22, %s769_s10 }
 0x1b9   : > { %264 = vrot.lane.b32.xlu1 %v258_v23, %s768_s8  ;;  %262 = vrot.lane.b32.xlu0 %v257_v22, %s768_s8 }
 0x1bd   : > { %344 = vperm.xlu1 %670, %v334_v27   ;;  %339 = vperm.xlu0 %669, %v333_v28  }
 0x1c1   : > { %349 = vperm.xlu1 %670, %v335_v29   ;;  %354 = vperm.xlu0 %669, %v336_v30  }
 0x20f   : > { %v319_v31 = vpop.permute.xlu1 %318  ;;  %v317_v32 = vpop.permute.xlu0 %316 }
 0x210   : > { %v321_v33 = vsel %vm320_vm5, %v317_v32, %v319_v31 }
 0x211   : > { %323 = vst [vmem:[#allocation2 + $0x20] sm:$0xf] %v321_v33 }
 0x213   : > { %v303_v34 = vpop.permute.xlu1 %302  ;;  %v301_v35 = vpop.permute.xlu0 %300 }
 0x214   : > { %v305_v36 = vsel %vm304_vm6, %v301_v35, %v303_v34 }
 0x215   : > { %307 = vst [vmem:[#allocation2 + $0x18] sm:$0xf] %v305_v36 }
 0x217   : > { %v311_v37 = vpop.permute.xlu1 %310  ;;  %v309_v38 = vpop.permute.xlu0 %308 }
 0x218   : > { %v313_v39 = vsel %vm312_vm7, %v309_v38, %v311_v37  ;;  %v332_v40 = vld [vmem:[#allocation2 + $0x20] sm:$0xf] }
 0x219   : > { %315 = vst [vmem:[#allocation2 + $0x1c] sm:$0xf] %v313_v39  ;;  %583 = vmatprep.subr.msk.mxu0 %vm370_vm8, %v332_v40  ;;  %599 = vmatprep.subr.msk.mxu1 %vm370_vm8, %v332_v40 }
 0x21a   : > { %584 = vmatpush3.msk.msra.mxu0 %vm370_vm8, %v332_v40  ;;  %604 = vmatpush3.msk.msra.mxu1 %vm370_vm8, %v332_v40 }
 0x21b   : > { %v287_v41 = vpop.permute.xlu1 %286  ;;  %v285_v42 = vpop.permute.xlu0 %284 }
 0x21c   : > { %v289_v43 = vsel %vm288_vm9, %v285_v42, %v287_v41 }
 0x21d   : > { %291 = vst [vmem:[#allocation2 + $0x10] sm:$0xf] %v289_v43 }
 0x21f   : > { %v295_v44 = vpop.permute.xlu1 %294  ;;  %v293_v45 = vpop.permute.xlu0 %292 }
 0x220   : > { %v297_v46 = vsel %vm296_vm10, %v293_v45, %v295_v44  ;;  %v331_v47 = vld [vmem:[#allocation2 + $0x18] sm:$0xff] }
 0x221   : > { %299 = vst [vmem:[#allocation2 + $0x14] sm:$0xf] %v297_v46  ;;  %585 = vmatprep.subr.mxu0 %v331_v47  ;;  %600 = vmatprep.subr.mxu1 %v331_v47 }
 0x222   : > { %586 = vmatpush3.msra.mxu0 %v331_v47  ;;  %605 = vmatpush3.msra.mxu1 %v331_v47 }
 0x223   : > { %v272_v48 = vpop.permute.xlu1 %271  ;;  %v270_v49 = vpop.permute.xlu0 %269 }
 0x224   : > { %v274_v50 = vsel %vm273_vm11, %v270_v49, %v272_v48 }
 0x225   : > { %276 = vst [vmem:[#allocation2 + $0x8] sm:$0xf] %v274_v50 }
 0x227   : > { %v280_v51 = vpop.permute.xlu1 %279  ;;  %v278_v52 = vpop.permute.xlu0 %277 }
 0x228   : > { %v281_v53 = vsel %vm244_vm1, %v278_v52, %v280_v51  ;;  %v330_v54 = vld [vmem:[#allocation2 + $0x10] sm:$0xff] }
 0x229   : > { %283 = vst [vmem:[#allocation2 + $0xc] sm:$0xf] %v281_v53  ;;  %587 = vmatprep.subr.mxu0 %v330_v54  ;;  %601 = vmatprep.subr.mxu1 %v330_v54 }
 0x22a   : > { %588 = vmatpush3.msra.mxu0 %v330_v54  ;;  %606 = vmatpush3.msra.mxu1 %v330_v54 }
 0x22b   : > { %v265_v55 = vpop.permute.xlu1 %264  ;;  %v263_v56 = vpop.permute.xlu0 %262 }
 0x22c   : > { %v266_v57 = vsel %vm228_vm0, %v263_v56, %v265_v55 }
 0x22d   : > { %268 = vst [vmem:[#allocation2 + $0x4] sm:$0xf] %v266_v57 }
 0x230   : > { %v329_v58 = vld [vmem:[#allocation2 + $0x8] sm:$0xff] }
 0x231   : > { %589 = vmatprep.subr.mxu0 %v329_v58  ;;  %602 = vmatprep.subr.mxu1 %v329_v58 }
 0x232   : > { %590 = vmatpush3.msra.mxu0 %v329_v58  ;;  %607 = vmatpush3.msra.mxu1 %v329_v58 }
 0x234   : > { %v328_v59 = vld [vmem:[#allocation2] sm:$0xff] }
 0x235   : > { %591 = vmatprep.subr.mxu0 %v328_v59  ;;  %603 = vmatprep.subr.mxu1 %v328_v59 }
 0x236   : > { %592 = vmatpush3.msra.mxu0 %v328_v59  ;;  %608 = vmatpush3.msra.mxu1 %v328_v59 }
 0x237   : > { %594 = vmatmul.mubr.msk.f32.vlgmr.msra.gmra.mxu0 %vm357_vm4, %v325_v60  ;;  %597 = vmatmul.mubr.msk.f32.vlgmr.msra.gmra.mxu1 %vm357_vm4, %v327_v61 }
 0x238   : > { %v340_v62 = vpop.permute.xlu0 %339  ;;  %v345_v63 = vpop.permute.xlu1 %344 }
 0x23c   : > { %v355_v0 = vpop.permute.xlu0 %354  ;;  %v350_v3 = vpop.permute.xlu1 %349 }
 0x2f7   : > { %v595_v1 = vpop.f32.mrf.mxu0  ;;  %v598_v2 = vpop.f32.mrf.mxu1 }
 0x2f8   : > { %v446_v4 = vadd.f32 %v595_v1, %v345_v63  ;;  %v456_v5 = vadd.f32 %v598_v2, %v355_v0 }
 0x2f9   : > { %v440_v6 = vpop.f32.mrf.mxu0  ;;  %v450_v7 = vpop.f32.mrf.mxu1 }
 0x2fa   : > { %460 = vst [vmem:[%s215_s9 + $0x8] sm:$0xff] %v446_v4  ;;  %462 = vst [vmem:[%s215_s9 + $0x18] sm:$0xff] %v456_v5  ;;  %v441_v8 = vadd.f32 %v440_v6, %v340_v62  ;;  %v451_v9 = vadd.f32 %v450_v7, %v350_v3 }
 0x2fc   : > { %459 = vst [vmem:[%s215_s9] sm:$0xff] %v441_v8  ;;  %461 = vst [vmem:[%s215_s9 + $0x10] sm:$0xff] %v451_v9 }
 0x2fd   : > { %712 = shalt.err (!%p709_p10)
}
 0x2fe   : > { %s713_s29 = scalar_lea.hbm %s964_s14, 512  ;;  %s717_s5 = scalar_lea.hbm %s1011_s4, 1024 }
 0x2ff   : > { %p714_p0 = scmp.ne.s32.totalorder %s964_s14, %s713_s29  ;;  %p718_p1 = scmp.lt.s32.totalorder %s964_s14, %s1011_s4 }
 0x300   : > { %p719_p3 = scmp.lt.s32.totalorder %s717_s5, %s713_s29 }
 0x301   : > { %p715_p2 = pnand %p714_p0, %p1020_p12 }
 0x302   : > { %p720_p6 = por %p719_p3, %p718_p1 }
 0x303   : > { %p716_p9 = pneg %p715_p2 }
 0x305   : > { %p721_p11 = pnand %p720_p6, %p716_p9 }
 0x307   : > { %724 = shalt.err (!%p721_p11)
}
 0x308   : > { %s779_s9 = smov 128   ;;  %s780_s22 = smov 8  }
 0x309   : > { %611 = dma.vmem_to_hbm [thread:$0]  (%p1020_p12), %s959_s20, 512, %s964_s14, %s464_s19, %s779_s9, %s779_s9, %s780_s22  }
 0x30a PF: > { %s492_s10 = sand.u32 1, %s751_s15   ;;  %p1021_p13 = scmp.ne.s32.totalorder %s1017_s28, 0 }
 0x30b   : > { %p1022_p4 = scmp.ge.s32.totalorder %s763_s18, 2  ;;  %s493_s26 = scalar_lea.sflag [#allocation5], %s492_s10 }
 0x30d   : > { %p618_p5 = pnand %p1022_p4, %p1021_p13 }
 0x30f   : > { %p619_p7 = pneg %p618_p5 }
 0x311   : > { %746 = dma.done.wait (%p619_p7), %s493_s26, 512  }
 0x312   : > { %748 = vsyncadd (%p619_p7), %s493_s26, 4294966784  ;;  %p17_p8 = scmp.ge.s32.totalorder %s831_s21, 4   ;;  %s1023_s15 = smov %s755_s16 }
 0x313   : > { %s1024_s16 = smov %s759_s17  ;;  %s1025_s17 = smov %s843_s24 }
 0x314   : > { %s1026_s18 = smov %s831_s21  ;;  %19 = sbr.rel (!%p17_p8) target bundleno = 5 (0x5), region = 84 }
 0x319   :  { %498 = vsyncpa [#allocation4], 1 }
 0x31a   :  { %500 = vsyncpa [#allocation4 + $0x1], 1 }
 0x31b   :  { %501 = vsyncpa [#allocation5], 1 }
 0x31c   :  { %503 = vsyncpa [#allocation5 + $0x1], 1 }

</bundles_post_ra>
